<compile_context>
chip_gen: v6e
topology: v6e:2x2x1
jax: 0.10.0
libtpu: 0.0.40
codegen_flags: <defaults>
</compile_context>

<pallas_src>
import functools

import jax
import jax.numpy as jnp
from jax.experimental import pallas as pl
from jax.experimental.pallas import tpu as pltpu

ALPHA = 1.0
GAMMA = 2

LANES = 128                      # lane width (last dim)
SUB = 8                          # sublane granularity
MAX_ROW_TILE = 8192              # 8192*128*4B = 4 MiB per f32 input block per step
VMEM_LIMIT_BYTES = 32 * 1024 * 1024


def _cdiv(a, b):
    return -(-a // b)


def _default_num_partial_sums():
    """2 partial-sum blocks on chips with 2 TensorCores per device (v7x / megacore),
    1 on single-TensorCore chips (v5e / v6e) where the split is pure overhead."""
    try:
        kind = jax.devices()[0].device_kind.lower()
    except Exception:
        return 1
    if "lite" in kind or "v5e" in kind or "v6e" in kind:
        return 1
    return 2


def _focal_elementwise(x, t, alpha, gamma):
    """Exact focal loss per element in f32 (used for the ragged tail + reference)."""
    x = x.astype(jnp.float32)
    t = t.astype(jnp.float32)
    bce = jnp.maximum(x, 0.0) - x * t + jnp.log1p(jnp.exp(-jnp.abs(x)))
    pt = jnp.exp(-bce)
    g = float(gamma)
    mod = (1.0 - pt) ** (int(g) if g.is_integer() else g)
    f = mod * bce
    if alpha != 1.0:
        f = alpha * f
    return f


def _focal_kernel(x_ref, t_ref, out_ref, *, alpha, gamma, hard_targets):
    i = pl.program_id(1)  # inner reduction step ("arbitrary")

    @pl.when(i == 0)
    def _():
        out_ref[...] = jnp.zeros_like(out_ref)

    # Native dtype on the HBM->VMEM path; cast to f32 in-kernel (free on VPU).
    x = x_ref[...].astype(jnp.float32)
    t = t_ref[...].astype(jnp.float32)

    # Numerically stable BCE-with-logits (matches torch BCEWithLogits, weight=None):
    #   bce = max(x, 0) - x*t + log1p(exp(-|x|))
    e = jnp.exp(-jnp.abs(x))                       # EUP
    bce = jnp.maximum(x, 0.0) - x * t + jnp.log1p(e)   # VPU + EUP(log1p)

    if hard_targets:
        # pt = exp(-bce) = exp(x*t - max(x,0)) / (1 + e). For hard {0,1} targets the
        # numerator is just select(1, e) on whether sign(x) matches the target, and
        # the divide is an approx EUP reciprocal -> 2 full transcendentals/element.
        mismatch = (x >= 0.0) != (t >= 0.5)
        pt = jnp.where(mismatch, e, 1.0) * pl.reciprocal(1.0 + e, approx=True)
    else:
        pt = jnp.exp(-bce)                         # exact, valid for soft targets

    one_minus_pt = 1.0 - pt
    g = float(gamma)
    if g.is_integer():
        mod = one_minus_pt ** int(g)               # integer_pow -> VPU multiplies
    else:
        mod = one_minus_pt ** g

    focal = mod * bce
    if alpha != 1.0:                               # fold away the alpha=1 multiply
        focal = alpha * focal

    # Leading-axis reduce into the resident (8,128) accumulator block; the tiny
    # cross-lane sum + /N is deferred to the XLA epilogue.
    out_ref[...] += focal.reshape(-1, SUB, LANES).sum(axis=0)


def focal_loss(inputs, targets, alpha=ALPHA, gamma=GAMMA, reduction="mean", *,
               hard_targets=False, num_partial_sums=None, max_row_tile=MAX_ROW_TILE):
    """Focal loss. inputs/targets: same shape (e.g. NCHW logits)."""
    assert inputs.shape == targets.shape
    total_n = int(inputs.size)
    x_flat = inputs.reshape(-1)
    t_flat = targets.reshape(-1)

    max_row_tile = max(SUB, (int(max_row_tile) // SUB) * SUB)
    nc_req = num_partial_sums if num_partial_sums is not None else _default_num_partial_sums()
    rows_usable = total_n // LANES            # complete 128-lane rows

    def _tiling(nc):
        # All blocks fully in-bounds by construction: coverage = nc*inner*row_tile
        # rows <= rows_usable, row_tile a multiple of 8 and as large as possible.
        if rows_usable < nc * SUB:
            return None
        steps = max(1, _cdiv(rows_usable, nc * max_row_tile))
        row_tile = min(max_row_tile, (rows_usable // (nc * steps)) // SUB * SUB)
        if row_tile == 0:
            return None
        inner = rows_usable // (nc * row_tile)
        return nc, inner, row_tile

    tiling = _tiling(nc_req) or _tiling(1)

    if tiling is None:
        # Fewer than 1024 elements: not worth a kernel launch; pure-XLA fallback.
        loss_sum = jnp.sum(_focal_elementwise(x_flat, t_flat, alpha, gamma))
    else:
        nc, inner, row_tile = tiling
        rows_main = nc * inner * row_tile

        # Lane-dense 2D view. Free bitcast when total_n % 128 == 0; otherwise pad
        # only the <128-element remainder (the padded row is never read by the grid).
        if total_n % LANES == 0:
            x2 = x_flat.reshape(-1, LANES)
            t2 = t_flat.reshape(-1, LANES)
        else:
            pad = LANES - total_n % LANES
            x2 = jnp.pad(x_flat, (0, pad)).reshape(-1, LANES)
            t2 = jnp.pad(t_flat, (0, pad)).reshape(-1, LANES)

        kernel = functools.partial(
            _focal_kernel, alpha=float(alpha), gamma=gamma, hard_targets=hard_targets)

        partials = pl.pallas_call(
            kernel,
            out_shape=jax.ShapeDtypeStruct((nc * SUB, LANES), jnp.float32),
            grid_spec=pltpu.PrefetchScalarGridSpec(
                num_scalar_prefetch=0,
                grid=(nc, inner),
                in_specs=[
                    pl.BlockSpec((row_tile, LANES), lambda c, i: (c * inner + i, 0)),
                    pl.BlockSpec((row_tile, LANES), lambda c, i: (c * inner + i, 0)),
                ],
                out_specs=pl.BlockSpec((SUB, LANES), lambda c, i: (c, 0)),
            ),
            compiler_params=pltpu.CompilerParams(
                dimension_semantics=("parallel", "arbitrary"),
                vmem_limit_bytes=VMEM_LIMIT_BYTES,
            ),
        )(x2, t2)

        loss_sum = jnp.sum(partials)

        # Ragged tail (< nc*row_tile rows plus the <128-elem remainder): tiny exact
        # XLA epilogue on the ORIGINAL flat inputs — no in-kernel masking needed.
        tail_start = rows_main * LANES
        if tail_start < total_n:
            loss_sum = loss_sum + jnp.sum(
                _focal_elementwise(x_flat[tail_start:], t_flat[tail_start:], alpha, gamma))

    if reduction == "mean":
        return loss_sum / total_n
    elif reduction == "sum":
        return loss_sum
    else:
        raise NotImplementedError("reduction='none' is not supported by the Pallas kernel")


def _focal_loss_ref(inputs, targets, alpha=ALPHA, gamma=GAMMA):
    return jnp.mean(_focal_elementwise(inputs, targets, alpha, gamma))


if __name__ == "__main__":
    key = jax.random.PRNGKey(0)
    k1, k2, k3, k4 = jax.random.split(key, 4)

    # NCHW logits and binary targets, small shape: (2, 4, 16, 16) -> 2048 elems.
    x = jax.random.normal(k1, (2, 4, 16, 16), dtype=jnp.float32) * 2.0
    t = (jax.random.uniform(k2, (2, 4, 16, 16)) > 0.5).astype(jnp.float32)

    out = jax.block_until_ready(focal_loss(x, t))
    ref = _focal_loss_ref(x, t)
    assert jnp.allclose(out, ref, rtol=1e-5, atol=1e-6), (out, ref)

    # Multi-step accumulation path (inner > 1) and the 2-way partial-sum path,
    # forced explicitly so they are exercised regardless of the chip generation.
    out_acc = jax.block_until_ready(
        focal_loss(x, t, max_row_tile=8, num_partial_sums=1))
    assert jnp.allclose(out_acc, ref, rtol=1e-5, atol=1e-6), (out_acc, ref)
    out_2c = jax.block_until_ready(focal_loss(x, t, num_partial_sums=2))
    assert jnp.allclose(out_2c, ref, rtol=1e-5, atol=1e-6), (out_2c, ref)

    # Reduced-EUP path for hard {0,1} targets (uses approx reciprocal -> looser tol).
    out_hard = jax.block_until_ready(focal_loss(x, t, hard_targets=True))
    assert jnp.allclose(out_hard, ref, rtol=2e-3, atol=1e-4), (out_hard, ref)

    # Ragged shape: element count not a multiple of 128 -> tiny XLA tail epilogue.
    x_odd = jax.random.normal(k3, (2, 3, 15, 17), dtype=jnp.float32)
    t_odd = (jax.random.uniform(k4, (2, 3, 15, 17)) > 0.5).astype(jnp.float32)
    out_odd = jax.block_until_ready(focal_loss(x_odd, t_odd))
    ref_odd = _focal_loss_ref(x_odd, t_odd)
    assert jnp.allclose(out_odd, ref_odd, rtol=1e-5, atol=1e-6), (out_odd, ref_odd)

    print("KERNEL_OK")
</pallas_src>

<mosaic_0001>
module attributes {stable_mosaic.version = 11 : i64} {
  func.func @_focal_kernel(%arg0: i32, %arg1: i32, %arg2: memref<8x128xf32, #tpu.memory_space<vmem>>, %arg3: memref<8x128xf32, #tpu.memory_space<vmem>>, %arg4: memref<8x128xf32, #tpu.memory_space<vmem>>) attributes {dimension_semantics = [#tpu.dimension_semantics<parallel>, #tpu.dimension_semantics<arbitrary>], iteration_bounds = array<i64: 2, 1>, scalar_prefetch = 0 : i64, scratch_operands = 0 : i64, tpu.core_type = #tpu.core_type<tc>, window_params = [{transform_indices = @transform_0, window_bounds = array<i64: 8, 128>}, {transform_indices = @transform_1, window_bounds = array<i64: 8, 128>}, {transform_indices = @transform_2, window_bounds = array<i64: 8, 128>}]} {
    %c0_i32 = arith.constant 0 : i32
    %0 = arith.cmpi eq, %arg1, %c0_i32 : i32
    %1 = arith.extui %0 : i1 to i32
    %c0_i32_0 = arith.constant 0 : i32
    %2 = arith.cmpi ne, %1, %c0_i32_0 : i32
    scf.if %2 {
      %cst_12 = arith.constant 0.000000e+00 : f32
      %27 = vector.broadcast %cst_12 : f32 to vector<8x128xf32>
      %c0_13 = arith.constant 0 : index
      %c0_14 = arith.constant 0 : index
      %28 = vector.load %arg4[%c0_13, %c0_14] : memref<8x128xf32, #tpu.memory_space<vmem>>, vector<8x128xf32>
      tpu.vector_store %arg4[%c0_13, %c0_14], %27 {strides = array<i32>} : memref<8x128xf32, #tpu.memory_space<vmem>>, vector<8x128xf32>,
    } else {
    }
    %c0 = arith.constant 0 : index
    %c0_1 = arith.constant 0 : index
    %3 = vector.load %arg2[%c0, %c0_1] : memref<8x128xf32, #tpu.memory_space<vmem>>, vector<8x128xf32>
    %c0_2 = arith.constant 0 : index
    %c0_3 = arith.constant 0 : index
    %4 = vector.load %arg3[%c0_2, %c0_3] : memref<8x128xf32, #tpu.memory_space<vmem>>, vector<8x128xf32>
    %5 = math.absf %3 : vector<8x128xf32>
    %cst = arith.constant 0.000000e+00 : f32
    %6 = vector.broadcast %cst : f32 to vector<8x128xf32>
    %7 = arith.subf %6, %5 : vector<8x128xf32>
    %8 = math.exp %7 : vector<8x128xf32>
    %cst_4 = arith.constant 0.000000e+00 : f32
    %9 = vector.broadcast %cst_4 : f32 to vector<8x128xf32>
    %10 = arith.maximumf %3, %9 : vector<8x128xf32>
    %11 = arith.mulf %3, %4 : vector<8x128xf32>
    %12 = arith.subf %10, %11 : vector<8x128xf32>
    %13 = math.log1p %8 : vector<8x128xf32>
    %14 = arith.addf %12, %13 : vector<8x128xf32>
    %cst_5 = arith.constant 0.000000e+00 : f32
    %15 = vector.broadcast %cst_5 : f32 to vector<8x128xf32>
    %16 = arith.subf %15, %14 : vector<8x128xf32>
    %17 = math.exp %16 : vector<8x128xf32>
    %cst_6 = arith.constant 1.000000e+00 : f32
    %18 = vector.broadcast %cst_6 : f32 to vector<8x128xf32>
    %19 = arith.subf %18, %17 : vector<8x128xf32>
    %20 = arith.mulf %19, %19 : vector<8x128xf32>
    %21 = arith.mulf %20, %14 : vector<8x128xf32>
    %c0_7 = arith.constant 0 : index
    %c0_8 = arith.constant 0 : index
    %22 = vector.load %arg4[%c0_7, %c0_8] : memref<8x128xf32, #tpu.memory_space<vmem>>, vector<8x128xf32>
    %23 = vector.shape_cast %21 : vector<8x128xf32> to vector<1x8x128xf32>
    %cst_9 = arith.constant dense<0.000000e+00> : vector<8x128xf32>
    %24 = vector.multi_reduction <add>, %23, %cst_9 [0] : vector<1x8x128xf32> to vector<8x128xf32>
    %25 = arith.addf %22, %24 : vector<8x128xf32>
    %c0_10 = arith.constant 0 : index
    %c0_11 = arith.constant 0 : index
    %26 = vector.load %arg4[%c0_10, %c0_11] : memref<8x128xf32, #tpu.memory_space<vmem>>, vector<8x128xf32>
    tpu.vector_store %arg4[%c0_10, %c0_11], %25 {strides = array<i32>} : memref<8x128xf32, #tpu.memory_space<vmem>>, vector<8x128xf32>,
    return
  }
  func.func @transform_0(%arg0: i32, %arg1: i32) -> (i32, i32) {
    %c1_i32 = arith.constant 1 : i32
    %0 = arith.muli %arg0, %c1_i32 : i32
    %1 = arith.addi %0, %arg1 : i32
    %c0_i32 = arith.constant 0 : i32
    %c0_i32_0 = arith.constant 0 : i32
    return %1, %c0_i32 : i32, i32
  }
  func.func @transform_1(%arg0: i32, %arg1: i32) -> (i32, i32) {
    %c1_i32 = arith.constant 1 : i32
    %0 = arith.muli %arg0, %c1_i32 : i32
    %1 = arith.addi %0, %arg1 : i32
    %c0_i32 = arith.constant 0 : i32
    %c0_i32_0 = arith.constant 0 : i32
    return %1, %c0_i32 : i32, i32
  }
  func.func @transform_2(%arg0: i32, %arg1: i32) -> (i32, i32) {
    %c0_i32 = arith.constant 0 : i32
    %c0_i32_0 = arith.constant 0 : i32
    return %arg0, %c0_i32 : i32, i32
  }
}

</mosaic_0001>

<bundles_post_ra>
// kernel: tpu_custom_call.1
= control target key start
LH: loop header
LB: loop body
LE: loop exit
PB: predicated region body
PF: predicated region fallthrough
CT: control target
= control target key end

     0   :  { %7 = vsyncpa [#allocation3], 0  ;;  %s783_s0 = inlined_call_operand.hbm [shape: f32[16,128], index: 0, kind: input, shape index: {}]   ;;  %s784_s1 = inlined_call_operand.hbm [shape: f32[16,128], index: 1, kind: input, shape index: {}]   ;;  %s785_s2 = inlined_call_operand.hbm [shape: f32[16,128], index: 2, kind: output, shape index: {}]  }
   0x1   :  { %9 = vsyncpa [#allocation3 + $0x1], 0 }
   0x2   :  { %10 = vsyncpa [#allocation6], 0 }
   0x3   :  { %12 = vsyncpa [#allocation6 + $0x1], 0 }
   0x4   :  { %13 = vsyncpa [#allocation4], 0 }
   0x5   :  { %15 = vsyncpa [#allocation4 + $0x1], 0  ;;  %s617_s9 = smov 0   ;;  %s619_s10 = smov 0  }
   0x6   :  { %s621_s11 = smov 0   ;;  %s623_s12 = smov 0  }
   0x7   :  { %s625_s13 = smov 0   ;;  %s627_s14 = smov 0  }
   0x8 LB: > { %s367_s15 = sadd.s32 4294967295, %s597_s14   ;;  %s368_s16 = sadd.s32 4294967294, %s597_s14   ;;  %s597_s14 = sphi %s627_s14, %s21_s14   ;;  %s593_s13 = sphi %s625_s13, %s797_s13   ;;  %s589_s12 = sphi %s623_s12, %s796_s12   ;;  %s585_s11 = sphi %s621_s11, %s795_s11   ;;  %s581_s10 = sphi %s619_s10, %s794_s10   ;;  %s577_s9 = sphi %s617_s9, %s793_s9  }
   0x9   : > { %s33_s17 = sadd.s32 1, %s593_s13  ;;  %s42_s18 = sadd.s32 1, %s585_s11 }
   0xa   : > { %p35_p0 = scmp.ge.s32.totalorder %s33_s17, 2  ;;  %p49_p1 = scmp.ne.s32.totalorder %s585_s11, %s581_s10 }
   0xb   : > { %p50_p2 = scmp.eq.s32.totalorder %s597_s14, 0  ;;  %p55_p3 = scmp.ne.s32.totalorder %s581_s10, %s577_s9 }
   0xc   : > { %s799_s17 = smov (%p35_p0, %s33_s17), 0  ;;  %p56_p5 = scmp.eq.s32.totalorder %s367_s15, 0 }
   0xd   : > { %p658_p4 = por %p50_p2, %p49_p1  ;;  %s39_s20 = ssub.s32 %s593_s13, %s799_s17 }
   0xe   : > { %p107_p6 = scmp.eq.s32.totalorder %s367_s15, 1  ;;  %p40_p7 = scmp.eq.s32.totalorder %s39_s20, 0 }
   0xf   : > { %p664_p8 = por %p56_p5, %p55_p3  ;;  %p113_p10 = scmp.eq.s32.totalorder %s368_s16, 1 }
  0x10   : > { %p668_p9 = por %p107_p6, %p49_p1  ;;  %p400_p13 = scmp.lt.s32.totalorder %s597_s14, 2 }
  0x11   : > { %s673_s23 = scalar_select %p40_p7, %s585_s11, %s42_s18  }
  0x12   : > { %p675_p11 = por %p113_p10, %p55_p3  ;;  %s682_s25 = sand.u32 1, %s585_s11  }
  0x13   : > { %s371_s26 = sshll.u32 %s682_s25, 3  ;;  %s372_s27 = sshll.u32 %s593_s13, 7 }
  0x14   : > { %s143_s30 = scalar_lea.hbm %s783_s0, %s372_s27  ;;  %s137_s3 = scalar_lea.vmem [#allocation2], %s371_s26 }
  0x15   : > { %s145_s4 = sshll.u32 %s137_s3, 4  ;;  %p691_p0 = pnand %p400_p13, %p658_p4  ;;  %s146_s4 = int_to_ptr.vmem [resolvable:$true] %s145_s4 }
  0x16   : > { %p375_p1 = scmp.ge.s32.totalorder %s597_s14, 1  ;;  %p169_p2 = scmp.lt.s32.totalorder %s597_s14, 3 }
  0x17   : > { %s134_s6 = scalar_lea.sflag [#allocation3], %s682_s25  ;;  %p459_p3 = pneg %p691_p0 }
  0x18   : > { %s470_s7 = scalar_lea.vmem %s146_s4, 128  ;;  %s599_s8 = smov [#allocation2]  }
  0x19   : > { %p471_p5 = scmp.ne.s32.totalorder %s146_s4, %s470_s7  ;;  %s475_s15 = sshll.u32 %s599_s8, 4  ;;  %s476_s15 = int_to_ptr.vmem [resolvable:$false] %s475_s15 }
  0x1a   : > { %s477_s16 = scalar_lea.vmem %s476_s15, 256  ;;  %p478_p4 = scmp.lt.s32.totalorder %s146_s4, %s476_s15 }
  0x1b   : > { %p473_p6 = pnand %p471_p5, %p459_p3  ;;  %p479_p10 = scmp.lt.s32.totalorder %s477_s16, %s470_s7 }
  0x1d   : > { %p474_p7 = pneg %p473_p6  ;;  %p480_p13 = por %p479_p10, %p478_p4 }
  0x1f   : > { %p481_p12 = pnand %p480_p13, %p474_p7 }
  0x21   : > { %484 = shalt.err (!%p481_p12)
}
  0x22   : > { %392 = dma.hbm_to_vmem [thread:$0]  (!%p691_p0), %s143_s30, 128, %s146_s4, %s134_s6  }
  0x23   : > { %p709_p5 = pnand %p375_p1, %p169_p2  ;;  %s162_s28 = scalar_lea.hbm %s784_s1, %s372_s27 }
  0x24   : > { %s156_s29 = scalar_lea.vmem [#allocation5], %s371_s26  ;;  %s153_s7 = scalar_lea.sflag [#allocation6], %s682_s25 }
  0x25   : > { %s164_s3 = sshll.u32 %s156_s29, 4  ;;  %s600_s30 = smov [#allocation5]   ;;  %s165_s3 = int_to_ptr.vmem [resolvable:$true] %s164_s3 }
  0x26   : > { %s498_s8 = scalar_lea.vmem %s165_s3, 128  ;;  %s503_s4 = sshll.u32 %s600_s30, 4  ;;  %s504_s4 = int_to_ptr.vmem [resolvable:$false] %s503_s4 }
  0x27   : > { %p499_p12 = scmp.ne.s32.totalorder %s165_s3, %s498_s8  ;;  %s505_s6 = scalar_lea.vmem %s504_s4, 256 }
  0x28   : > { %p506_p1 = scmp.lt.s32.totalorder %s165_s3, %s504_s4  ;;  %p507_p2 = scmp.lt.s32.totalorder %s505_s6, %s498_s8 }
  0x29   : > { %p501_p6 = pnand %p499_p12, %p459_p3 }
  0x2a   : > { %p508_p4 = por %p507_p2, %p506_p1 }
  0x2b   : > { %p502_p7 = pneg %p501_p6 }
  0x2d   : > { %p509_p10 = pnand %p508_p4, %p502_p7 }
  0x2f   : > { %512 = shalt.err (!%p509_p10)
}
  0x30   : > { %395 = dma.hbm_to_vmem [thread:$0]  (!%p691_p0), %s162_s28, 128, %s165_s3, %s153_s7  }
  0x31   : > { %173 = sbr.rel (%p709_p5) target bundleno = 136 (0x88), region = 28  ;;  %s725_s25 = sand.u32 (!%p709_p5), 1, %s581_s10  }
  0x32   : > { %s728_s26 = sshll.u32 (!%p709_p5), %s725_s25, 3  ;;  %s176_s27 = scalar_lea.sflag (!%p709_p5), [#allocation3], %s725_s25 }
  0x33   : > { %s179_s15 = scalar_lea.vmem (!%p709_p5), [#allocation2], %s728_s26 }
  0x36   : > { %564 = dma.done.wait (%p664_p8), %s176_s27, 128  }
  0x37   : > { %566 = vsyncadd (%p664_p8), %s176_s27, 4294967168  ;;  %s185_s5 = scalar_lea.sflag [#allocation6], %s725_s25  ;;  %s188_s16 = scalar_lea.vmem [#allocation5], %s728_s26 }
  0x38   : > { %568 = dma.done.wait (%p664_p8), %s185_s5, 128  }
  0x39   : > { %570 = vsyncadd (%p664_p8), %s185_s5, 4294967168  ;;  %v221_v0 = vld [vmem:[%s179_s15] sm:$0xff]  ;;  %v222_v7 = vld [vmem:[%s188_s16] sm:$0xff]  ;;  %s380_s21 = sshll.u32 %s589_s12, 7  ;;  %s213_s18 = scalar_lea.vmem [#allocation7], %s728_s26 }
  0x3a   : > { %v223_v1 = vand.u32 2147483647, %v221_v0  ;;  %v227_v9 = vmax.f32 %v221_v0, 0.0  ;;  %v228_v10 = vmul.f32 %v222_v7, %v221_v0  ;;  %s264_s19 = sshll.u32 %s213_s18, 4  ;;  %s262_s29 = scalar_lea.hbm %s785_s2, %s380_s21  ;;  %s265_s19 = int_to_ptr.vmem [resolvable:$true] %s264_s19 }
  0x3b   : > { %s251_s3 = scalar_lea.sflag [#allocation4], %s725_s25  ;;  %s513_s7 = scalar_lea.vmem %s265_s19, 128 }
  0x3c   : > { %v224_v2 = vsub.f32 0.0, %v223_v1  ;;  %v229_v14 = vsub.f32 %v227_v9, %v228_v10  ;;  %p514_p8 = scmp.ne.s32.totalorder %s265_s19, %s513_s7  ;;  %s601_s8 = smov [#allocation7]  }
  0x3d   : > { %s517_s30 = sshll.u32 %s601_s8, 4  ;;  %s518_s30 = int_to_ptr.vmem [resolvable:$false] %s517_s30 }
  0x3e   : > { %v225_v3 = vmul.f32 1.442695, %v224_v2  ;;  %p515_p0 = pnand %p514_p8, %p668_p9  ;;  %s519_s4 = scalar_lea.vmem %s518_s30, 256 }
  0x3f   : > { %p520_p13 = scmp.lt.s32.totalorder %s265_s19, %s518_s30  ;;  %p521_p5 = scmp.lt.s32.totalorder %s519_s4, %s513_s7 }
  0x40   : > { %451 = vpow2.f32 %v225_v3  ;;  %p516_p3 = pneg %p515_p0 }
  0x41   : > { %p522_p12 = por %p521_p5, %p520_p13 }
  0x43   : > { %p523_p6 = pnand %p522_p12, %p516_p3 }
  0x4d   : > { %v452_v4 = vpop.eup %451 }
  0x4e   : > { %v230_v5 = vadd.f32 1.0, %v452_v4  ;;  %v233_v6 = vmul.f32 -0.5, %v452_v4  ;;  %v236_v11 = vand.u32 2147483647, %v452_v4 }
  0x50   : > { %453 = vlog2.f32 %v230_v5  ;;  %v234_v8 = vadd.f32 1.0, %v233_v6  ;;  %vm237_vm0 = vcmp.lt.f32.partialorder %v236_v11, 0.0004427343 }
  0x52   : > { %v235_v12 = vmul.f32 %v452_v4, %v234_v8 }
  0x5d   : > { %v454_v13 = vpop.eup %453 }
  0x5e   : > { %v232_v15 = vmul.f32 0.6931472, %v454_v13 }
  0x60   : > { %v238_v16 = vsel %vm237_vm0, %v235_v12, %v232_v15 }
  0x61   : > { %v239_v17 = vadd.f32 %v238_v16, %v229_v14 }
  0x63   : > { %v240_v18 = vsub.f32 0.0, %v239_v17 }
  0x65   : > { %v241_v19 = vmul.f32 1.442695, %v240_v18 }
  0x67   : > { %455 = vpow2.f32 %v241_v19 }
  0x74   : > { %v456_v20 = vpop.eup %455 }
  0x75   : > { %v243_v21 = vsub.f32 1.0, %v456_v20 }
  0x77   : > { %v244_v22 = vmul.f32 %v243_v21, %v243_v21 }
  0x79   : > { %v245_v23 = vmul.f32 %v244_v22, %v239_v17 }
  0x7b   : > { %249 = vst [vmem:[%s213_s18] sm:$0xff] %v245_v23 }
  0x7c   : > { %526 = shalt.err (!%p523_p6)
}
  0x7d   : > { %s527_s12 = scalar_lea.hbm %s262_s29, 128  ;;  %s531_s26 = scalar_lea.hbm %s785_s2, 256 }
  0x7e   : > { %p528_p7 = scmp.ne.s32.totalorder %s262_s29, %s527_s12  ;;  %p532_p4 = scmp.lt.s32.totalorder %s262_s29, %s785_s2 }
  0x7f   : > { %p533_p10 = scmp.lt.s32.totalorder %s531_s26, %s527_s12 }
  0x80   : > { %p529_p1 = pnand %p528_p7, %p668_p9 }
  0x81   : > { %p534_p8 = por %p533_p10, %p532_p4 }
  0x82   : > { %p530_p2 = pneg %p529_p1 }
  0x84   : > { %p535_p0 = pnand %p534_p8, %p530_p2 }
  0x86   : > { %538 = shalt.err (!%p535_p0)
}
  0x87   : > { %387 = dma.vmem_to_hbm [thread:$0]  (%p668_p9), %s265_s19, 128, %s262_s29, %s251_s3  }
  0x88 PF: > { %s276_s5 = sand.u32 1, %s577_s9   ;;  %p792_p3 = scmp.ge.s32.totalorder %s597_s14, 2 }
  0x89   : > { %s277_s16 = scalar_lea.sflag [#allocation4], %s276_s5 }
  0x8a   : > { %p397_p13 = pnand %p792_p3, %p675_p11 }
  0x8c   : > { %p398_p5 = pneg %p397_p13 }
  0x8e   : > { %572 = dma.done.wait (%p398_p5), %s277_s16, 128  }
  0x8f   : > { %574 = vsyncadd (%p398_p5), %s277_s16, 4294967168  ;;  %s21_s14 = sadd.s32 1, %s597_s14   ;;  %s793_s9 = smov %s581_s10 }
  0x90   : > { %p18_p12 = scmp.ge.s32.totalorder %s21_s14, 4   ;;  %s794_s10 = smov %s585_s11 }
  0x91   : > { %s795_s11 = smov %s673_s23  ;;  %s796_s12 = smov %s593_s13 }
  0x92   : > { %s797_s13 = smov %s799_s17  ;;  %20 = sbr.rel (!%p18_p12) target bundleno = 8 (0x8), region = 90 }
  0x97   :  { %282 = vsyncpa [#allocation3], 1 }
  0x98   :  { %284 = vsyncpa [#allocation3 + $0x1], 1 }
  0x99   :  { %285 = vsyncpa [#allocation6], 1 }
  0x9a   :  { %287 = vsyncpa [#allocation6 + $0x1], 1 }
  0x9b   :  { %288 = vsyncpa [#allocation4], 1 }
  0x9c   :  { %290 = vsyncpa [#allocation4 + $0x1], 1 }

</bundles_post_ra>
